<compile_context>
chip_gen: v7x
topology: tpu7x:2x2x1
jax: 0.10.0
libtpu: 0.0.40
codegen_flags: <defaults>
</compile_context>

<pallas_src>
import functools
import math

import jax
import jax.numpy as jnp
from jax import lax
from jax.experimental import pallas as pl
from jax.experimental.pallas import tpu as pltpu


def _embeddings_kernel(ids_ref,        # (N_pad,) int32  -- SMEM scalar prefetch
                       tids_ref,       # (TB, 1)  int32  -- VMEM tile
                       pos_ref,        # (TB, 1)  f32    -- VMEM tile
                       word_hbm,       # (V, H)   f32    -- HBM (pl.ANY)
                       type_ref,       # (T, H)   f32    -- VMEM (resident)
                       sin_ref,        # (2, H)   f32    -- row0=div_full, row1=phase
                       ln_ref,         # (2, H)   f32    -- row0=gamma,   row1=beta
                       out_ref,        # (TB, H)  f32    -- VMEM output tile
                       gather_buf,     # (TB, H)  f32    -- VMEM scratch
                       gather_sem,     # DMA sems (TB,)
                       *, eps):
    tb, h = out_ref.shape
    base = pl.program_id(0) * tb

    # ---- word-embedding row gather: issue TB concurrent HBM->VMEM DMAs ----
    @pl.loop(0, tb)
    def _issue(r):
        row = ids_ref[base + r]
        pltpu.make_async_copy(word_hbm.at[row], gather_buf.at[r],
                              gather_sem.at[r]).start()

    # ---- token-type embeddings: tiny vocab -> VPU selects (no MXU) --------
    # (overlaps with the gather DMAs above)
    tids = tids_ref[...]                                   # (TB, 1) int32
    n_types = type_ref.shape[0]
    type_e = jnp.zeros((tb, h), jnp.float32)
    for t in range(n_types):                               # static unroll, T is tiny
        type_e = jnp.where(tids == t, type_ref[t], type_e)

    # ---- sinusoidal position embeddings: single fused sin -----------------
    # pe[:, k] = sin(pos * div_full[k] + phase[k]),  phase = pi/2 on odd cols.
    pos = pos_ref[...]                                     # (TB, 1) f32
    pe = jnp.sin(pos * sin_ref[0] + sin_ref[1])            # (TB, H)

    # ---- wait for the gathered word-embedding rows -------------------------
    @pl.loop(0, tb)
    def _wait(r):
        pltpu.make_async_copy(word_hbm.at[0], gather_buf.at[r],
                              gather_sem.at[r]).wait()

    emb = gather_buf[...] + type_e + pe                    # (TB, H) f32

    # ---- LayerNorm with fused single-pass statistics -----------------------
    inv_h = 1.0 / h
    s1 = jnp.sum(emb, axis=-1, keepdims=True)
    s2 = jnp.sum(emb * emb, axis=-1, keepdims=True)
    mean = s1 * inv_h
    var = s2 * inv_h - mean * mean
    inv_std = lax.rsqrt(var + eps)
    result = (emb - mean) * inv_std * ln_ref[0] + ln_ref[1]

    # dropout: eval-mode identity (hidden_dropout_prob ignored at inference)
    out_ref[...] = result.astype(out_ref.dtype)


def tab_static_former_embeddings(input_ids,
                                 word_emb, type_emb,
                                 even_div_term, odd_div_term,
                                 ln_weight, ln_bias,
                                 token_type_ids=None,
                                 position_ids=None,
                                 past_key_values_length=0,
                                 layer_norm_eps=1e-12,
                                 token_tile=256):
    B, S = input_ids.shape
    V, H = word_emb.shape
    T = type_emb.shape[0]
    N = B * S

    # ---- id / position broadcasting (plain JAX, matches the module) -------
    if position_ids is None:
        position_ids = (jnp.arange(S, dtype=jnp.int32)
                        + jnp.int32(past_key_values_length))[None, :]
    position_ids = jnp.broadcast_to(position_ids, (B, S)).astype(jnp.int32)

    if token_type_ids is None:
        token_type_ids = jnp.zeros((B, S), dtype=jnp.int32)
    token_type_ids = jnp.broadcast_to(token_type_ids, (B, S)).astype(jnp.int32)

    # ---- token tiling: multiple of 8 sublanes, pad token count ------------
    tb = max(8, min(int(token_tile), ((N + 7) // 8) * 8))
    tb = (tb // 8) * 8
    n_pad = ((N + tb - 1) // tb) * tb
    num_tiles = n_pad // tb
    pad = n_pad - N

    ids_flat = input_ids.reshape(N).astype(jnp.int32)
    tids_flat = token_type_ids.reshape(N, 1)
    pos_flat = position_ids.reshape(N, 1).astype(jnp.float32)
    if pad:
        ids_flat = jnp.pad(ids_flat, (0, pad))
        tids_flat = jnp.pad(tids_flat, ((0, pad), (0, 0)))
        pos_flat = jnp.pad(pos_flat, ((0, pad), (0, 0)))

    # ---- small parameter packs --------------------------------------------
    # div_full interleaves even/odd terms; phase adds pi/2 on odd columns so
    # sin(angle + phase) reproduces the sin/cos interleave with a single sin.
    div_full = jnp.stack([even_div_term, odd_div_term], axis=-1).reshape(H)
    phase = jnp.tile(jnp.array([0.0, math.pi / 2.0], jnp.float32), H // 2)
    sin_params = jnp.stack([div_full.astype(jnp.float32), phase], axis=0)   # (2, H)
    ln_params = jnp.stack([ln_weight.astype(jnp.float32),
                           ln_bias.astype(jnp.float32)], axis=0)            # (2, H)

    grid_spec = pltpu.PrefetchScalarGridSpec(
        num_scalar_prefetch=1,                      # input ids -> SMEM
        grid=(num_tiles,),
        in_specs=[
            pl.BlockSpec((tb, 1), lambda i, ids: (i, 0)),    # token_type_ids
            pl.BlockSpec((tb, 1), lambda i, ids: (i, 0)),    # position ids (f32)
            pl.BlockSpec(memory_space=pl.ANY),               # word table stays in HBM
            pl.BlockSpec((T, H), lambda i, ids: (0, 0)),     # type table (VMEM resident)
            pl.BlockSpec((2, H), lambda i, ids: (0, 0)),     # div/phase
            pl.BlockSpec((2, H), lambda i, ids: (0, 0)),     # LN gamma/beta
        ],
        out_specs=pl.BlockSpec((tb, H), lambda i, ids: (i, 0)),
        scratch_shapes=[
            pltpu.VMEM((tb, H), jnp.float32),                # gathered word rows
            pltpu.SemaphoreType.DMA((tb,)),
        ],
    )

    out_flat = pl.pallas_call(
        functools.partial(_embeddings_kernel, eps=float(layer_norm_eps)),
        out_shape=jax.ShapeDtypeStruct((n_pad, H), jnp.float32),
        grid_spec=grid_spec,
        compiler_params=pltpu.CompilerParams(
            dimension_semantics=("parallel",),               # megacore on v7x
            vmem_limit_bytes=32 * 1024 * 1024),
    )(ids_flat, tids_flat, pos_flat,
      word_emb.astype(jnp.float32), type_emb.astype(jnp.float32),
      sin_params, ln_params)

    return out_flat[:N].reshape(B, S, H)


def _reference(input_ids, token_type_ids, position_ids,
               word_emb, type_emb, even_div, odd_div, ln_w, ln_b, eps):
    H = word_emb.shape[-1]
    ie = word_emb[input_ids]
    te = type_emb[token_type_ids]
    pos = position_ids.astype(jnp.float32)
    sin_p = jnp.sin(pos[..., None] * even_div)
    cos_p = jnp.cos(pos[..., None] * odd_div)
    pe = jnp.stack([sin_p, cos_p], axis=-1).reshape(pos.shape + (H,))
    emb = ie + te + pe
    mean = emb.mean(-1, keepdims=True)
    var = ((emb - mean) ** 2).mean(-1, keepdims=True)
    return (emb - mean) / jnp.sqrt(var + eps) * ln_w + ln_b


if __name__ == "__main__":
    # small config consistent with the module
    B, S, H = 2, 8, 32
    vocab_size, type_vocab_size = 64, 2
    pad_token_id = 0
    layer_norm_eps = 1e-12

    key = jax.random.PRNGKey(0)
    k_w, k_t, k_ids, k_tid = jax.random.split(key, 4)

    # deterministic synthetic parameters
    word_emb = 0.02 * jax.random.normal(k_w, (vocab_size, H), jnp.float32)
    word_emb = word_emb.at[pad_token_id].set(0.0)       # nn.Embedding padding_idx
    type_emb = 0.02 * jax.random.normal(k_t, (type_vocab_size, H), jnp.float32)
    ln_weight = jnp.ones((H,), jnp.float32)              # nn.LayerNorm default init
    ln_bias = jnp.zeros((H,), jnp.float32)

    # registered buffers (faithful to the PyTorch __init__ formulas)
    even_div_term = jnp.exp(2.0 * jnp.arange(0, H, 2, dtype=jnp.float32)
                            * -(math.log(10000.0) / H))
    odd_div_term = jnp.exp(2.0 * jnp.arange(1, H, 2, dtype=jnp.float32)
                           * -(math.log(10000.0) / H))

    input_ids = jax.random.randint(k_ids, (B, S), 0, vocab_size, jnp.int32)
    token_type_ids = jax.random.randint(k_tid, (B, S), 0, type_vocab_size, jnp.int32)

    out = tab_static_former_embeddings(
        input_ids, word_emb, type_emb, even_div_term, odd_div_term,
        ln_weight, ln_bias, token_type_ids=token_type_ids,
        layer_norm_eps=layer_norm_eps,
        token_tile=8)                                    # 2 grid steps at this size
    out = jax.block_until_ready(out)

    # sanity check vs pure-JAX reference of the same math
    position_ids = jnp.broadcast_to(jnp.arange(S, dtype=jnp.int32)[None, :], (B, S))
    ref = _reference(input_ids, token_type_ids, position_ids,
                     word_emb, type_emb, even_div_term, odd_div_term,
                     ln_weight, ln_bias, layer_norm_eps)
    assert out.shape == (B, S, H)
    assert jnp.allclose(out, ref, atol=1e-4, rtol=1e-4), (
        float(jnp.max(jnp.abs(out - ref))))

    print("KERNEL_OK")
</pallas_src>

<mosaic_0001>
module attributes {stable_mosaic.version = 11 : i64} {
  func.func @_embeddings_kernel(%arg0: i32, %arg1: memref<16xi32, #tpu.memory_space<smem>>, %arg2: memref<8x1xi32, #tpu.memory_space<vmem>>, %arg3: memref<8x1xf32, #tpu.memory_space<vmem>>, %arg4: memref<64x32xf32, #tpu.memory_space<any>>, %arg5: memref<2x32xf32, #tpu.memory_space<vmem>>, %arg6: memref<2x32xf32, #tpu.memory_space<vmem>>, %arg7: memref<2x32xf32, #tpu.memory_space<vmem>>, %arg8: memref<8x32xf32, #tpu.memory_space<vmem>>, %arg9: memref<8x32xf32, #tpu.memory_space<vmem>>, %arg10: memref<8x!tpu.dma_semaphore, #tpu.memory_space<semaphore_mem>>) attributes {dimension_semantics = [#tpu.dimension_semantics<parallel>], iteration_bounds = array<i64: 2>, scalar_prefetch = 1 : i64, scratch_operands = 2 : i64, tpu.core_type = #tpu.core_type<tc>, window_params = [{transform_indices = @transform_0, window_bounds = array<i64: 8, 1>}, {transform_indices = @transform_1, window_bounds = array<i64: 8, 1>}, {}, {pipeline_mode = #tpu.pipeline_mode<synchronous>, transform_indices = @transform_3, window_bounds = array<i64: 2, 32>}, {pipeline_mode = #tpu.pipeline_mode<synchronous>, transform_indices = @transform_4, window_bounds = array<i64: 2, 32>}, {pipeline_mode = #tpu.pipeline_mode<synchronous>, transform_indices = @transform_5, window_bounds = array<i64: 2, 32>}, {transform_indices = @transform_6, window_bounds = array<i64: 8, 32>}]} {
    %c8_i32 = arith.constant 8 : i32
    %0 = arith.muli %arg0, %c8_i32 : i32
    %c0_i32 = arith.constant 0 : i32
    %c8_i32_0 = arith.constant 8 : i32
    %1 = arith.addi %c0_i32, %c8_i32_0 : i32
    %c1_i32 = arith.constant 1 : i32
    scf.for %arg11 = %c0_i32 to %1 step %c1_i32  : i32 {
      %c1_i32_31 = arith.constant 1 : i32
      %68 = arith.muli %arg11, %c1_i32_31 : i32
      %c0_i32_32 = arith.constant 0 : i32
      %69 = arith.addi %c0_i32_32, %68 : i32
      %70 = arith.addi %0, %69 : i32
      %71 = arith.index_cast %70 : i32 to index
      %72 = memref.load %arg1[%71] : memref<16xi32, #tpu.memory_space<smem>>
      %c0_i32_33 = arith.constant 0 : i32
      %73 = tpu.memref_slice %arg4[%72, %c0_i32_33] : memref<64x32xf32, #tpu.memory_space<any>> -> memref<1x32xf32, #tpu.memory_space<any>>
      %74 = tpu.memref_squeeze %73 : memref<1x32xf32, #tpu.memory_space<any>> -> memref<32xf32, #tpu.memory_space<any>>
      %c0_i32_34 = arith.constant 0 : i32
      %75 = tpu.memref_slice %arg9[%69, %c0_i32_34] : memref<8x32xf32, #tpu.memory_space<vmem>> -> memref<1x32xf32, #tpu.memory_space<vmem>>
      %76 = tpu.memref_squeeze %75 : memref<1x32xf32, #tpu.memory_space<vmem>> -> memref<32xf32, #tpu.memory_space<vmem>>
      %77 = tpu.memref_slice %arg10[%69] : memref<8x!tpu.dma_semaphore, #tpu.memory_space<semaphore_mem>> -> memref<1x!tpu.dma_semaphore, #tpu.memory_space<semaphore_mem>>
      %78 = tpu.memref_squeeze %77 : memref<1x!tpu.dma_semaphore, #tpu.memory_space<semaphore_mem>> -> memref<!tpu.dma_semaphore, #tpu.memory_space<semaphore_mem>>
      tpu.enqueue_dma source(%74 : memref<32xf32, #tpu.memory_space<any>>) target(%76 : memref<32xf32, #tpu.memory_space<vmem>>) target_semaphore(%78 : memref<!tpu.dma_semaphore, #tpu.memory_space<semaphore_mem>>)
    }
    %c8_i32_1 = arith.constant 8 : i32
    %c0 = arith.constant 0 : index
    %c0_2 = arith.constant 0 : index
    %2 = vector.load %arg2[%c0, %c0_2] : memref<8x1xi32, #tpu.memory_space<vmem>>, vector<8x1xi32>
    %cst = arith.constant 0.000000e+00 : f32
    %3 = vector.broadcast %cst : f32 to vector<8x32xf32>
    %c0_i32_3 = arith.constant 0 : i32
    %4 = vector.broadcast %c0_i32_3 : i32 to vector<8x1xi32>
    %5 = arith.cmpi eq, %2, %4 : vector<8x1xi32>
    %c0_4 = arith.constant 0 : index
    %c0_5 = arith.constant 0 : index
    %6 = vector.load %arg5[%c0_4, %c0_5] : memref<2x32xf32, #tpu.memory_space<vmem>>, vector<1x32xf32>
    %7 = vector.shape_cast %6 : vector<1x32xf32> to vector<32xf32>
    %8 = vector.shape_cast %5 : vector<8x1xi1> to vector<8x1xi1>
    %9 = vector.broadcast %8 : vector<8x1xi1> to vector<8x32xi1>
    %10 = vector.shape_cast %7 : vector<32xf32> to vector<1x32xf32>
    %11 = vector.broadcast %10 : vector<1x32xf32> to vector<8x32xf32>
    %12 = arith.select %9, %11, %3 : vector<8x32xi1>, vector<8x32xf32>
    %c1_i32_6 = arith.constant 1 : i32
    %13 = vector.broadcast %c1_i32_6 : i32 to vector<8x1xi32>
    %14 = arith.cmpi eq, %2, %13 : vector<8x1xi32>
    %c1 = arith.constant 1 : index
    %c0_7 = arith.constant 0 : index
    %15 = vector.load %arg5[%c1, %c0_7] : memref<2x32xf32, #tpu.memory_space<vmem>>, vector<1x32xf32>
    %16 = vector.shape_cast %15 : vector<1x32xf32> to vector<32xf32>
    %17 = vector.shape_cast %14 : vector<8x1xi1> to vector<8x1xi1>
    %18 = vector.broadcast %17 : vector<8x1xi1> to vector<8x32xi1>
    %19 = vector.shape_cast %16 : vector<32xf32> to vector<1x32xf32>
    %20 = vector.broadcast %19 : vector<1x32xf32> to vector<8x32xf32>
    %21 = arith.select %18, %20, %12 : vector<8x32xi1>, vector<8x32xf32>
    %c0_8 = arith.constant 0 : index
    %c0_9 = arith.constant 0 : index
    %22 = vector.load %arg3[%c0_8, %c0_9] : memref<8x1xf32, #tpu.memory_space<vmem>>, vector<8x1xf32>
    %c0_10 = arith.constant 0 : index
    %c0_11 = arith.constant 0 : index
    %23 = vector.load %arg6[%c0_10, %c0_11] : memref<2x32xf32, #tpu.memory_space<vmem>>, vector<1x32xf32>
    %24 = vector.shape_cast %23 : vector<1x32xf32> to vector<32xf32>
    %25 = vector.shape_cast %24 : vector<32xf32> to vector<1x32xf32>
    %26 = vector.broadcast %22 : vector<8x1xf32> to vector<8x32xf32>
    %27 = vector.broadcast %25 : vector<1x32xf32> to vector<8x32xf32>
    %28 = arith.mulf %26, %27 : vector<8x32xf32>
    %c1_12 = arith.constant 1 : index
    %c0_13 = arith.constant 0 : index
    %29 = vector.load %arg6[%c1_12, %c0_13] : memref<2x32xf32, #tpu.memory_space<vmem>>, vector<1x32xf32>
    %30 = vector.shape_cast %29 : vector<1x32xf32> to vector<32xf32>
    %31 = vector.shape_cast %30 : vector<32xf32> to vector<1x32xf32>
    %32 = vector.broadcast %31 : vector<1x32xf32> to vector<8x32xf32>
    %33 = arith.addf %28, %32 : vector<8x32xf32>
    %34 = math.sin %33 : vector<8x32xf32>
    %c0_i32_14 = arith.constant 0 : i32
    %c8_i32_15 = arith.constant 8 : i32
    %35 = arith.addi %c0_i32_14, %c8_i32_15 : i32
    %c1_i32_16 = arith.constant 1 : i32
    scf.for %arg11 = %c0_i32_14 to %35 step %c1_i32_16  : i32 {
      %c1_i32_31 = arith.constant 1 : i32
      %68 = arith.muli %arg11, %c1_i32_31 : i32
      %c0_i32_32 = arith.constant 0 : i32
      %69 = arith.addi %c0_i32_32, %68 : i32
      %c0_i32_33 = arith.constant 0 : i32
      %c0_i32_34 = arith.constant 0 : i32
      %70 = tpu.memref_slice %arg4[%c0_i32_33, %c0_i32_34] : memref<64x32xf32, #tpu.memory_space<any>> -> memref<1x32xf32, #tpu.memory_space<any>>
      %71 = tpu.memref_squeeze %70 : memref<1x32xf32, #tpu.memory_space<any>> -> memref<32xf32, #tpu.memory_space<any>>
      %c0_i32_35 = arith.constant 0 : i32
      %72 = tpu.memref_slice %arg9[%69, %c0_i32_35] : memref<8x32xf32, #tpu.memory_space<vmem>> -> memref<1x32xf32, #tpu.memory_space<vmem>>
      %73 = tpu.memref_squeeze %72 : memref<1x32xf32, #tpu.memory_space<vmem>> -> memref<32xf32, #tpu.memory_space<vmem>>
      %74 = tpu.memref_slice %arg10[%69] : memref<8x!tpu.dma_semaphore, #tpu.memory_space<semaphore_mem>> -> memref<1x!tpu.dma_semaphore, #tpu.memory_space<semaphore_mem>>
      %75 = tpu.memref_squeeze %74 : memref<1x!tpu.dma_semaphore, #tpu.memory_space<semaphore_mem>> -> memref<!tpu.dma_semaphore, #tpu.memory_space<semaphore_mem>>
      tpu.wait_dma2 semaphore(%75 : memref<!tpu.dma_semaphore, #tpu.memory_space<semaphore_mem>>) src(%71 : memref<32xf32, #tpu.memory_space<any>>) dst(%73 : memref<32xf32, #tpu.memory_space<vmem>>)
    }
    %c8_i32_17 = arith.constant 8 : i32
    %c0_18 = arith.constant 0 : index
    %c0_19 = arith.constant 0 : index
    %36 = vector.load %arg9[%c0_18, %c0_19] : memref<8x32xf32, #tpu.memory_space<vmem>>, vector<8x32xf32>
    %37 = arith.addf %36, %21 : vector<8x32xf32>
    %38 = arith.addf %37, %34 : vector<8x32xf32>
    %cst_20 = arith.constant dense<0.000000e+00> : vector<8xf32>
    %39 = vector.multi_reduction <add>, %38, %cst_20 [1] : vector<8x32xf32> to vector<8xf32>
    %40 = vector.shape_cast %39 : vector<8xf32> to vector<8x1xf32>
    %41 = arith.mulf %38, %38 : vector<8x32xf32>
    %cst_21 = arith.constant dense<0.000000e+00> : vector<8xf32>
    %42 = vector.multi_reduction <add>, %41, %cst_21 [1] : vector<8x32xf32> to vector<8xf32>
    %43 = vector.shape_cast %42 : vector<8xf32> to vector<8x1xf32>
    %cst_22 = arith.constant 3.125000e-02 : f32
    %44 = vector.broadcast %cst_22 : f32 to vector<8x1xf32>
    %45 = arith.mulf %40, %44 : vector<8x1xf32>
    %cst_23 = arith.constant 3.125000e-02 : f32
    %46 = vector.broadcast %cst_23 : f32 to vector<8x1xf32>
    %47 = arith.mulf %43, %46 : vector<8x1xf32>
    %48 = arith.mulf %45, %45 : vector<8x1xf32>
    %49 = arith.subf %47, %48 : vector<8x1xf32>
    %cst_24 = arith.constant 9.99999996E-13 : f32
    %50 = vector.broadcast %cst_24 : f32 to vector<8x1xf32>
    %51 = arith.addf %49, %50 : vector<8x1xf32>
    %52 = math.rsqrt %51 : vector<8x1xf32>
    %53 = vector.broadcast %45 : vector<8x1xf32> to vector<8x32xf32>
    %54 = arith.subf %38, %53 : vector<8x32xf32>
    %55 = vector.broadcast %52 : vector<8x1xf32> to vector<8x32xf32>
    %56 = arith.mulf %54, %55 : vector<8x32xf32>
    %c0_25 = arith.constant 0 : index
    %c0_26 = arith.constant 0 : index
    %57 = vector.load %arg7[%c0_25, %c0_26] : memref<2x32xf32, #tpu.memory_space<vmem>>, vector<1x32xf32>
    %58 = vector.shape_cast %57 : vector<1x32xf32> to vector<32xf32>
    %59 = vector.shape_cast %58 : vector<32xf32> to vector<1x32xf32>
    %60 = vector.broadcast %59 : vector<1x32xf32> to vector<8x32xf32>
    %61 = arith.mulf %56, %60 : vector<8x32xf32>
    %c1_27 = arith.constant 1 : index
    %c0_28 = arith.constant 0 : index
    %62 = vector.load %arg7[%c1_27, %c0_28] : memref<2x32xf32, #tpu.memory_space<vmem>>, vector<1x32xf32>
    %63 = vector.shape_cast %62 : vector<1x32xf32> to vector<32xf32>
    %64 = vector.shape_cast %63 : vector<32xf32> to vector<1x32xf32>
    %65 = vector.broadcast %64 : vector<1x32xf32> to vector<8x32xf32>
    %66 = arith.addf %61, %65 : vector<8x32xf32>
    %c0_29 = arith.constant 0 : index
    %c0_30 = arith.constant 0 : index
    %67 = vector.load %arg8[%c0_29, %c0_30] : memref<8x32xf32, #tpu.memory_space<vmem>>, vector<8x32xf32>
    tpu.vector_store %arg8[%c0_29, %c0_30], %66 {strides = array<i32>} : memref<8x32xf32, #tpu.memory_space<vmem>>, vector<8x32xf32>,
    return
  }
  func.func @transform_0(%arg0: i32, %arg1: memref<16xi32, #tpu.memory_space<smem>>) -> (i32, i32) {
    %c0_i32 = arith.constant 0 : i32
    %c0_i32_0 = arith.constant 0 : i32
    return %arg0, %c0_i32 : i32, i32
  }
  func.func @transform_1(%arg0: i32, %arg1: memref<16xi32, #tpu.memory_space<smem>>) -> (i32, i32) {
    %c0_i32 = arith.constant 0 : i32
    %c0_i32_0 = arith.constant 0 : i32
    return %arg0, %c0_i32 : i32, i32
  }
  func.func @transform_3(%arg0: i32, %arg1: memref<16xi32, #tpu.memory_space<smem>>) -> (i32, i32) {
    %c0_i32 = arith.constant 0 : i32
    %c0_i32_0 = arith.constant 0 : i32
    %c0_i32_1 = arith.constant 0 : i32
    return %c0_i32, %c0_i32_0 : i32, i32
  }
  func.func @transform_4(%arg0: i32, %arg1: memref<16xi32, #tpu.memory_space<smem>>) -> (i32, i32) {
    %c0_i32 = arith.constant 0 : i32
    %c0_i32_0 = arith.constant 0 : i32
    %c0_i32_1 = arith.constant 0 : i32
    return %c0_i32, %c0_i32_0 : i32, i32
  }
  func.func @transform_5(%arg0: i32, %arg1: memref<16xi32, #tpu.memory_space<smem>>) -> (i32, i32) {
    %c0_i32 = arith.constant 0 : i32
    %c0_i32_0 = arith.constant 0 : i32
    %c0_i32_1 = arith.constant 0 : i32
    return %c0_i32, %c0_i32_0 : i32, i32
  }
  func.func @transform_6(%arg0: i32, %arg1: memref<16xi32, #tpu.memory_space<smem>>) -> (i32, i32) {
    %c0_i32 = arith.constant 0 : i32
    %c0_i32_0 = arith.constant 0 : i32
    return %arg0, %c0_i32 : i32, i32
  }
}

</mosaic_0001>

<bundles_post_ra>
// kernel: tpu_custom_call.1
= control target key start
LH: loop header
LB: loop body
LE: loop exit
PB: predicated region body
PF: predicated region fallthrough
CT: control target
= control target key end

     0   :  { %s1069_s0 = inlined_call_operand.vmem [shape: s32[16], index: 0, kind: input, shape index: {}]   ;;  %s1070_s1 = inlined_call_operand.vmem [shape: s32[16,1], index: 1, kind: input, shape index: {}]   ;;  %s1071_s2 = inlined_call_operand.vmem [shape: f32[16,1], index: 2, kind: input, shape index: {}]   ;;  %s1072_s3 = inlined_call_operand.vmem [shape: f32[64,32], index: 3, kind: input, shape index: {}]   ;;  %s1073_s4 = inlined_call_operand.vmem [shape: f32[2,32], index: 4, kind: input, shape index: {}]   ;;  %s1074_s5 = inlined_call_operand.vmem [shape: f32[2,32], index: 5, kind: input, shape index: {}]   ;;  %s1075_s6 = inlined_call_operand.vmem [shape: f32[2,32], index: 6, kind: input, shape index: {}]   ;;  %s1076_s7 = inlined_call_operand.hbm [shape: f32[16,32], index: 7, kind: output, shape index: {}]  }
   0x1   :  { %s12_s26 = sshll.u32 %s1069_s0, 4  ;;  %s13_s26 = int_to_ptr.vmem [resolvable:$true] %s12_s26 }
   0x2   :  { %s758_s27 = scalar_lea.vmem %s13_s26, 16  ;;  %p763_p1 = scmp.lt.s32.totalorder %s13_s26, %s13_s26 }
   0x3   :  { %p759_p0 = scmp.ne.s32.totalorder %s13_s26, %s758_s27  ;;  %p764_p2 = scmp.lt.s32.totalorder %s758_s27, %s758_s27 }
   0x5   :  { %p765_p3 = por %p764_p2, %p763_p1 }
   0x7   :  { %p766_p4 = pnand %p765_p3, %p759_p0 }
   0x9   :  { %769 = shalt.err (!%p766_p4)  }
   0xa   :  { %s854_s28 = smov [#allocation5]  }
   0xb   :  { %15 = dma.vmem_to_smem %s13_s26, 16, %s854_s28, [#allocation4] }
   0xc   :  { %822 = dma.done.wait [#allocation4], 16 }
   0xd   :  { %823 = vsyncadd [#allocation4], 4294967280 }
   0xe   :  { %17 = sfence }
   0xf   :  { %18 = vsyncpa [#allocation7], 0 }
  0x10   :  { %20 = vsyncpa [#allocation7 + $0x1], 0  ;;  %s906_s29 = smov 0   ;;  %s908_s30 = smov 0  }
  0x11   :  { %s910_s0 = smov 0   ;;  %s912_s8 = smov 0  }
  0x12 LB: > { %1079 = sst [smem:[#allocation12_spill]] %s840_s0  ;;  %s927_s9 = sadd.s32 4294967295, %s844_s8   ;;  %s844_s8 = sphi %s912_s8, %s1088_s8   ;;  %s840_s0 = sphi %s910_s0, %s1085_s0   ;;  %s836_s30 = sphi %s908_s30, %s1087_s30   ;;  %s832_s29 = sphi %s906_s29, %s1086_s29  }
  0x13   : > { %s653_s10 = sadd.s32 4294967294, %s844_s8   ;;  %s931_s11 = sadd.s32 1, %s844_s8  }
  0x14   : > { %s148_s12 = sadd.s32 1, %s840_s0  ;;  %s145_s13 = ssub.s32 %s844_s8, %s931_s11 }
  0x15   : > { %p158_p5 = scmp.ne.s32.totalorder %s840_s0, %s836_s30  ;;  %p146_p6 = scmp.eq.s32.totalorder %s145_s13, 0 }
  0x16   : > { %p159_p7 = scmp.eq.s32.totalorder %s927_s9, 1  ;;  %p164_p8 = scmp.ne.s32.totalorder %s836_s30, %s832_s29 }
  0x17   : > { %p165_p9 = scmp.eq.s32.totalorder %s653_s10, 1  ;;  %p656_p12 = scmp.ge.s32.totalorder %s844_s8, 1 }
  0x18   : > { %s942_s14 = scalar_select %p146_p6, %s840_s0, %s148_s12  }
  0x19   : > { %p944_p10 = por %p159_p7, %p158_p5  ;;  %p948_p11 = por %p165_p9, %p164_p8 }
  0x1a   : > { %1080 = sst [smem:[#allocation13_spill]] %s942_s14  ;;  %p206_p13 = scmp.lt.s32.totalorder %s844_s8, 3 }
  0x1c   : > { %p207_p0 = pnand %p656_p12, %p206_p13 }
  0x1d   : > { %s1077_s17 = sand.u32 (!%p207_p0), 1, %s836_s30   ;;  %p237_p1 = scmp.lt.s32.totalorder (!%p207_p0), %s927_s9, 1 }
  0x1e   : > { %210 = sbr.rel (%p207_p0) target bundleno = 459 (0x1cb), region = 40  ;;  %s958_s18 = sshll.u32 (!%p207_p0), %s1077_s17, 3 }
  0x1f   : > { %s660_s19 = sshll.u32 (!%p207_p0), %s927_s9, 3  ;;  %s236_s28 = scalar_lea.vmem (!%p207_p0), [#allocation6], %s958_s18 }
  0x20   : > { %s846_s10 = smov (!%p207_p0), 0  }
  0x25   : > { %s238_s20 = scalar_select %p237_p1, %s927_s9, 1 }
  0x27   : > { %s658_s21 = sshll.u32 %s238_s20, 3 }
  0x28   : > { %s240_s24 = scalar_lea.vmem %s1070_s1, %s658_s21  ;;  %s244_s27 = scalar_lea.vmem %s1071_s2, %s658_s21 }
  0x29 LB: >> { %s252_s12 = sadd.s32 %s848_s10, %s660_s19  ;;  %s255_s20 = scalar_lea.vmem [#allocation2], %s848_s10  ;;  %s848_s10 = sphi %s846_s10, %s251_s10  }
  0x2a   : >> { %s253_s13 = sld [smem:[#allocation5 + %s252_s12]]  ;;  %s256_s22 = scalar_lea.sflag [#allocation3], %s848_s10 }
  0x30   : >> { %s254_s0 = scalar_lea.vmem %s1072_s3, %s253_s13 }
  0x31   : >> { %v274_v0 = vld [vmem:[%s254_s0] sm:$0x1] }
  0x32   : >> { %275 = vst [vmem:[%s255_s20] sm:$0x1] %v274_v0 }
  0x33   : >> { %300 = vsyncadd %s256_s22, 16  ;;  %s251_s10 = sadd.s32 1, %s848_s10  }
  0x34   : >> { %p248_p2 = scmp.ge.s32.totalorder %s251_s10, 8  }
  0x35   : > { %v326_v1 = vld [vmem:[%s244_s27] sm:$0xff] (%p248_p2)  ;;  %v855_v3 = vmov (%p248_p2), 0   ;;  %v856_v27 = vmov (%p248_p2), 683565275   ;;  %v857_v29 = vmov (%p248_p2), 2475754826  }
  0x36   : > { %250 = sbr.rel (!%p248_p2) target bundleno = 41 (0x29), region = 143  ;;  %v301_v2 = vld [vmem:[%s240_s24] sm:$0xff] (%p248_p2)  ;;  %750 = vset.pattern.permute.xlu0 (%p248_p2), %v855_v3  ;;  %751 = vset.pattern.permute.xlu1 (%p248_p2), %v855_v3  ;;  %v858_v32 = vmov (%p248_p2), 2131351028   ;;  %v859_v35 = vmov (%p248_p2), 2102212464  }
  0x37   : > { %vm302_vm0 = vcmp.eq.s32.totalorder (%p248_p2), %v301_v2, 0  ;;  %vm314_vm1 = vcmp.eq.s32.totalorder (%p248_p2), %v301_v2, 1  ;;  %330 = vperm.xlu0 (%p248_p2), %750, %v326_v1   ;;  %v663_v6 = vld [vmem:[%s1074_s5] ss:$0 sm:$0xff] (%p248_p2)  ;;  %v664_v7 = vld [vmem:[%s1074_s5 + $0x1] ss:$0 sm:$0xff] (%p248_p2) }
  0x38   : > { %v316_v4 = vsel (%p248_p2), %vm314_vm1, 1, %v855_v3  ;;  %v304_v5 = vsel (%p248_p2), %vm302_vm0, 1, %v855_v3  ;;  %v661_v12 = vld [vmem:[%s1073_s4] ss:$0 sm:$0xff] (%p248_p2)  ;;  %v662_v15 = vld [vmem:[%s1073_s4 + $0x1] ss:$0 sm:$0xff] (%p248_p2) }
  0x39   : > { %318 = vperm.xlu1 (%p248_p2), %751, %v316_v4   ;;  %v860_v38 = vmov (%p248_p2), 920167782   ;;  %v861_v41 = vmov (%p248_p2), 1326507024   ;;  %s850_s26 = smov (%p248_p2), 0  }
  0x3b   : > { %306 = vperm.xlu0 (%p248_p2), %750, %v304_v5  }
  0xb6   : > { %v331_v8 = vpop.permute.xlu0 %330 }
  0xb7   : > { %v337_v9 = vmul.f32 %v663_v6, %v331_v8 }
  0xb8   : > { %v319_v10 = vpop.permute.xlu1 %318 }
  0xb9   : > { %v978_v11 = vadd.f32 %v664_v7, %v337_v9  ;;  %vm320_vm2 = vcmp.eq.s32.totalorder %v319_v10, 1 }
  0xba   : > { %v307_v13 = vpop.permute.xlu0 %306 }
  0xbb   : > { %v347_v14 = vand.u32 2139095040, %v978_v11  ;;  %vm308_vm3 = vcmp.eq.s32.totalorder %v307_v13, 1  ;;  %v344_v21 = vand.u32 2147483647, %v978_v11  ;;  %vm346_vm11 = vcmp.lt.s32.totalorder %v978_v11, 0 }
  0xbc   : > { %v313_v17 = vsel %vm308_vm3, %v661_v12, 0.0  ;;  %vm436_vm0 = vweird.f32 %v978_v11 }
  0xbd   : > { %v348_v16 = vshrl.u32 %v347_v14, 23  ;;  %v987_v18 = vsel %vm320_vm2, %v662_v15, %v313_v17  ;;  %v351_v24 = vand.u32 8388607, %v344_v21  ;;  %vm345_vm12 = vcmp.le.f32.partialorder %v344_v21, 0.7853982 }
  0xbf   : > { %v665_v19 = vadd.s32 4294967169, %v348_v16  ;;  %v352_v43 = vor.u32 8388608, %v351_v24 }
  0xc1   : > { %v354_v20 = vadd.s32 1, %v665_v19  ;;  %v392_v57 = vshll.u32 %v352_v43, 8 }
  0xc3   : > { %vm355_vm4 = vcmp.gt.s32.totalorder %v354_v20, 0 }
  0xc4   : > { %v356_v22 = vsel %vm355_vm4, %v354_v20, 0 }
  0xc5   : > { %v358_v23 = vand.u32 31, %v356_v22  ;;  %v357_v26 = vshrl.u32 %v356_v22, 5 }
  0xc7   : > { %v359_v25 = vsub.s32 32, %v358_v23  ;;  %v361_v28 = vshll.u32 %v856_v27, %v358_v23  ;;  %v364_v30 = vshll.u32 %v857_v29, %v358_v23  ;;  %v367_v34 = vshll.u32 %v858_v32, %v358_v23 }
  0xc8   : > { %v370_v37 = vshll.u32 %v859_v35, %v358_v23  ;;  %v373_v40 = vshll.u32 %v860_v38, %v358_v23  ;;  %vm376_vm5 = vcmp.lt.s32.totalorder %v357_v26, 1  ;;  %vm379_vm6 = vcmp.lt.s32.totalorder %v357_v26, 4 }
  0xc9   : > { %v362_v31 = vshrl.u32 %v857_v29, %v359_v25  ;;  %v365_v33 = vshrl.u32 %v858_v32, %v359_v25  ;;  %v368_v36 = vshrl.u32 %v859_v35, %v359_v25  ;;  %v371_v39 = vshrl.u32 %v860_v38, %v359_v25 }
  0xca   : > { %v374_v42 = vshrl.u32 %v861_v41, %v359_v25  ;;  %v360_v52 = vshrl.u32 %v856_v27, %v359_v25  ;;  %vm378_vm7 = vcmp.lt.s32.totalorder %v357_v26, 3  ;;  %vm377_vm8 = vcmp.lt.s32.totalorder %v357_v26, 2 }
  0xcb   : > { %v363_v44 = vor.u32 %v362_v31, %v361_v28  ;;  %v366_v45 = vor.u32 %v365_v33, %v364_v30  ;;  %v369_v46 = vor.u32 %v368_v36, %v367_v34  ;;  %v372_v47 = vor.u32 %v371_v39, %v370_v37 }
  0xcc   : > { %v375_v48 = vor.u32 %v374_v42, %v373_v40 }
  0xcd   : > { %v381_v49 = vsel %vm379_vm6, %v369_v46, 2102212464  ;;  %v384_v50 = vsel %vm376_vm5, %v363_v44, %v366_v45  ;;  %v388_v51 = vsel %vm376_vm5, %v366_v45, %v369_v46  ;;  %v385_v53 = vsel %vm379_vm6, %v372_v47, 920167782 }
  0xce   : > { %v389_v54 = vsel %vm379_vm6, %v375_v48, 1326507024  ;;  %v386_v55 = vsel %vm378_vm7, %v369_v46, %v385_v53  ;;  %v380_v58 = vsel %vm376_vm5, %v360_v52, %v363_v44  ;;  %v382_v59 = vsel %vm378_vm7, %v366_v45, %v381_v49 }
  0xcf   : > { %v390_v56 = vsel %vm378_vm7, %v372_v47, %v389_v54  ;;  %v387_v60 = vsel %vm377_vm8, %v384_v50, %v386_v55  ;;  %v383_v2 = vsel %vm377_vm8, %v380_v58, %v382_v59 }
  0xd0   : > { %v391_v61 = vsel %vm377_vm8, %v388_v51, %v390_v56  ;;  %v995_v0 = vmul.u32.u64.low %v392_v57, %v387_v60  ;;  %v996_v1 = vmul.u32.u64.high %v392_v57, %v387_v60, %v995_v0  ;;  %v399_v4 = vmul.u32 %v392_v57, %v383_v2 }
  0xd1   : > { %v992_v62 = vmul.u32.u64.low %v392_v57, %v391_v61  ;;  %v993_v63 = vmul.u32.u64.high %v392_v57, %v391_v61, %v992_v62 }
  0xd2   : > { %v402_v3 = vadd.s32 1, %v996_v1 }
  0xd3   : > { %vm401_vm9 = vc.u32 %v993_v63, %v995_v0  ;;  %v400_v17 = vadd.s32 %v995_v0, %v993_v63 }
  0xd4   : > { %v403_v5 = vsel %vm401_vm9, %v402_v3, %v996_v1 }
  0xd5   : > { %v404_v6 = vadd.s32 %v403_v5, %v399_v4 }
  0xd7   : > { %v405_v7 = vadd.s32 536870912, %v404_v6 }
  0xd9   : > { %v406_v8 = vshrl.u32 %v405_v7, 30 }
  0xdb   : > { %v407_v9 = vshll.u32 %v406_v8, 30  ;;  %v430_v31 = vsub.s32 4, %v406_v8 }
  0xdd   : > { %v408_v10 = vsub.s32 %v404_v6, %v407_v9  ;;  %v431_v34 = vsel %vm346_vm11, %v430_v31, %v406_v8 }
  0xde   : > { %v433_v36 = vsel %vm345_vm12, 0, %v431_v34 }
  0xdf   : > { %v410_v12 = vsub.s32 0, %v408_v10  ;;  %v437_v37 = vadd.s32 3, %v433_v36 }
  0xe1   : > { %v666_v13 = vmin.u32 %v410_v12, %v408_v10  ;;  %v438_v38 = vand.u32 3, %v437_v37 }
  0xe3   : > { %v412_v14 = vclz %v666_v13  ;;  %vm443_vm13 = vcmp.eq.s32.totalorder %v438_v38, 2  ;;  %vm440_vm14 = vcmp.eq.s32.totalorder %v438_v38, 0  ;;  %vm439_vm15 = vcmp.lt.s32.totalorder %v438_v38, 2 }
  0xe5   : > { %v667_v15 = vadd.s32 4294967294, %v412_v14 }
  0xe7   : > { %vm668_vm10 = vcmp.lt.s32.totalorder %v667_v15, 0 }
  0xe8   : > { %v415_v16 = vsel %vm668_vm10, 0, %v667_v15 }
  0xe9   : > { %v416_v19 = vsub.s32 32, %v415_v16  ;;  %v420_v20 = vsub.s32 4294967266, %v415_v16  ;;  %v417_v22 = vshll.u32 %v408_v10, %v415_v16 }
  0xeb   : > { %v418_v23 = vshrl.u32 %v400_v17, %v416_v19  ;;  %v421_v24 = vadd.s32 127, %v420_v20 }
  0xed   : > { %v419_v25 = vor.u32 %v418_v23, %v417_v22  ;;  %v422_v26 = vshll.u32 %v421_v24, 23 }
  0xef   : > { %v423_v27 = vor.u32 4788187, %v422_v26  ;;  %v426_v29 = vcvt.s32.f32 %v419_v25 }
  0xf1   : > { %v424_v28 = vand.u32 2147483647, %v423_v27 }
  0xf3   : > { %v427_v30 = vmul.f32 %v426_v29, %v424_v28 }
  0xf5   : > { %v428_v32 = vxor.u32 2147483648, %v427_v30 }
  0xf7   : > { %v429_v33 = vsel %vm346_vm11, %v428_v32, %v427_v30 }
  0xf8   : > { %v432_v35 = vsel %vm345_vm12, %v978_v11, %v429_v33 }
  0xf9   : > { %752 = vcosq.f32 %v432_v35 }
  0xfa   : > { %754 = vsinq.f32 %v432_v35 }
 0x103   : > { %v753_v39 = vpop.eup %752 }
 0x104   : > { %v755_v40 = vpop.eup %754  ;;  %v444_v41 = vxor.u32 2147483648, %v753_v39 }
 0x105   : > { %v441_v42 = vxor.u32 2147483648, %v755_v40 }
 0x106   : > { %v445_v43 = vsel %vm443_vm13, %v444_v41, %v755_v40 }
 0x107   : > { %v442_v44 = vsel %vm440_vm14, %v753_v39, %v441_v42 }
 0x108   : > { %v446_v21 = vsel %vm439_vm15, %v442_v44, %v445_v43 }
 0x109   : > { %v447_v45 = vsel %vm436_vm0, nan, %v446_v21 }
 0x10a LB: >> { %s454_s27 = scalar_lea.sflag [#allocation3], %s852_s26  ;;  %s852_s26 = sphi %s850_s26, %s453_s26  }
 0x10b   : >> { %824 = dma.done.wait %s454_s27, 16 }
 0x10c   : >> { %825 = vsyncadd %s454_s27, 4294967280  ;;  %s453_s26 = sadd.s32 1, %s852_s26  }
 0x10d   : >> { %p450_p3 = scmp.ge.s32.totalorder %s453_s26, 8  }
 0x10e   : > { %v457_v46 = vld [vmem:[#allocation2] sm:$0xff] (%p450_p3)  ;;  %vm460_vm1 = vcmask (%p450_p3), 261120   ;;  %s672_s22 = sshll.u32 (%p450_p3), %s927_s9, 7  ;;  %s503_s0 = sshll.u32 (%p450_p3), %s236_s28, 4  ;;  %s1024_s0 = int_to_ptr.vmem [resolvable:$true] %s503_s0 }
 0x10f   : > { %452 = sbr.rel (!%p450_p3) target bundleno = 266 (0x10a), region = 154  ;;  %v458_v47 = vadd.f32 (%p450_p3), %v457_v46, %v987_v18  ;;  %v669_v59 = vld [vmem:[%s1075_s6] ss:$0 sm:$0xff] (%p450_p3)  ;;  %v670_v61 = vld [vmem:[%s1075_s6 + $0x1] ss:$0 sm:$0xff] (%p450_p3)  ;;  %s1022_s21 = scalar_lea.hbm (%p450_p3), %s1076_s7, %s672_s22 }
 0x110   : > { %s1083_s19 = sand.u32 (%p450_p3), 1, %s836_s30   ;;  %s770_s9 = scalar_lea.vmem (%p450_p3), %s1024_s0, 128 }
 0x111   : > { %v459_v48 = vadd.f32 (%p450_p3), %v458_v47, %v447_v45  ;;  %s490_s23 = scalar_lea.sflag (%p450_p3), [#allocation7], %s1083_s19  ;;  %p771_p4 = scmp.ne.s32.totalorder (%p450_p3), %s1024_s0, %s770_s9 }
 0x112   : > { %s862_s24 = smov (%p450_p3), [#allocation6]  }
 0x113   : > { %v461_v11 = vsel (%p450_p3), %vm460_vm1, %v459_v48, 0.0  ;;  %v464_v49 = vmul.f32 (%p450_p3), %v459_v48, %v459_v48  ;;  %p772_p5 = pnand (%p450_p3), %p771_p4, %p944_p10  ;;  %s774_s25 = sshll.u32 (%p450_p3), %s862_s24, 4  ;;  %s775_s25 = int_to_ptr.vmem [resolvable:$false] %s774_s25 }
 0x114   : > { %462 = vadd.xlane.f32.xlu0 (%p450_p3), %v461_v11  ;;  %s776_s26 = scalar_lea.vmem (%p450_p3), %s775_s25, 256  ;;  %p777_p7 = scmp.lt.s32.totalorder (%p450_p3), %s1024_s0, %s775_s25 }
 0x115   : > { %v465_v50 = vsel (%p450_p3), %vm460_vm1, %v464_v49, 0.0  ;;  %p773_p6 = pneg (%p450_p3), %p772_p5  ;;  %p778_p8 = scmp.lt.s32.totalorder (%p450_p3), %s776_s26, %s770_s9 }
 0x117   : > { %p779_p9 = por %p778_p8, %p777_p7 }
 0x118   : > { %466 = vadd.xlane.f32.xlu0 %v465_v50 }
 0x119   : > { %p780_p12 = pnand %p779_p9, %p773_p6 }
 0x1a1   : > { %v463_v51 = vpop.xlane.xlu0 %462 }
 0x1a2   : > { %v468_v52 = vmul.f32 0.03125, %v463_v51 }
 0x1a4   : > { %v470_v54 = vmul.f32 %v468_v52, %v468_v52  ;;  %v474_v57 = vsub.f32 %v459_v48, %v468_v52 }
 0x1a5   : > { %v467_v53 = vpop.xlane.xlu0 %466 }
 0x1a6   : > { %v469_v55 = vmul.f32 0.03125, %v467_v53 }
 0x1a8   : > { %v471_v56 = vsub.f32 %v469_v55, %v470_v54 }
 0x1aa   : > { %v472_v18 = vadd.f32 1e-12, %v471_v56 }
 0x1ac   : > { %756 = vrsqrt.f32 %v472_v18 }
 0x1b6   : > { %v757_v58 = vpop.eup %756 }
 0x1b7   : > { %v475_v60 = vmul.f32 %v757_v58, %v474_v57 }
 0x1b9   : > { %v481_v62 = vmul.f32 %v669_v59, %v475_v60 }
 0x1bb   : > { %v487_v63 = vadd.f32 %v670_v61, %v481_v62 }
 0x1bd   : > { %488 = vst.msk [vmem:[%s236_s28] sm:$0xff] %vm460_vm1, %v487_v63 }
 0x1be   : > { %783 = shalt.err (!%p780_p12)
}
 0x1bf   : > { %s784_s18 = scalar_lea.hbm %s1022_s21, 128  ;;  %s788_s10 = scalar_lea.hbm %s1076_s7, 256 }
 0x1c0   : > { %p785_p13 = scmp.ne.s32.totalorder %s1022_s21, %s784_s18  ;;  %p789_p2 = scmp.lt.u32.totalorder %s1022_s21, %s1076_s7 }
 0x1c1   : > { %p790_p3 = scmp.lt.u32.totalorder %s788_s10, %s784_s18  ;;  %p792_p5 = scmp.lt.u32.totalorder %s784_s18, %s1022_s21 }
 0x1c2   : > { %p786_p0 = pnand %p785_p13, %p944_p10 }
 0x1c3   : > { %p791_p4 = por %p790_p3, %p789_p2 }
 0x1c4   : > { %p787_p1 = pneg %p786_p0 }
 0x1c5   : > { %p793_p6 = por %p792_p5, %p791_p4 }
 0x1c7   : > { %p794_p7 = pnand %p793_p6, %p787_p1 }
 0x1c9   : > { %797 = shalt.err (!%p794_p7)
}
 0x1ca   : > { %687 = dma.vmem_to_hbm [thread:$0]  (%p944_p10), %s1024_s0, 128, %s1022_s21, %s490_s23  }
 0x1cb PF: > { %p693_p8 = scmp.ge.s32.totalorder %s844_s8, 2  ;;  %s515_s20 = sand.u32 1, %s832_s29  }
 0x1cc   : > { %s516_s22 = scalar_lea.sflag [#allocation7], %s515_s20 }
 0x1cd   : > { %p690_p9 = pnand %p693_p8, %p948_p11 }
 0x1cf   : > { %827 = dma.done.wait (!%p690_p9), %s516_s22, 128  }
 0x1d0   : > { %829 = vsyncadd (!%p690_p9), %s516_s22, 4294967168  ;;  %s1084_s14 = sld [smem:[#allocation12_spill]]  ;;  %s1085_s0 = sld [smem:[#allocation13_spill]] }
 0x1d1   : > { %p23_p12 = scmp.ge.s32.totalorder %s931_s11, 4   ;;  %s1086_s29 = smov %s836_s30 }
 0x1d2   : > { %s1088_s8 = smov %s931_s11 }
 0x1d3   :  { %25 = sbr.rel (!%p23_p12) target bundleno = 18 (0x12), region = 165 }
 0x1d6   : > { %s1087_s30 = smov %s1084_s14 }
 0x1da   :  { %521 = vsyncpa [#allocation7], 1 }
 0x1db   :  { %523 = vsyncpa [#allocation7 + $0x1], 1 }
 0x1dc   :  { %524 = vsyncmov [#allocation3] }
 0x1df   :  { %s525_s8 = vpop.sfrf %524 }
 0x1e0   :  { %p675_p10 = scmp.ne.s32.totalorder %s525_s8, 0 }
 0x1e2   :  { %529 = shalt.err (%p675_p10)  }
 0x1e3   :  { %531 = vsyncmov [#allocation3 + $0x1] }
 0x1e6   :  { %s532_s15 = vpop.sfrf %531 }
 0x1e7   :  { %p676_p11 = scmp.ne.s32.totalorder %s532_s15, 0 }
 0x1e9   :  { %536 = shalt.err (%p676_p11)  }
 0x1ea   :  { %538 = vsyncmov [#allocation3 + $0x2] }
 0x1ed   :  { %s539_s16 = vpop.sfrf %538 }
 0x1ee   :  { %p677_p13 = scmp.ne.s32.totalorder %s539_s16, 0 }
 0x1f0   :  { %543 = shalt.err (%p677_p13)  }
 0x1f1   :  { %545 = vsyncmov [#allocation3 + $0x3] }
 0x1f4   :  { %s546_s17 = vpop.sfrf %545 }
 0x1f5   :  { %p678_p0 = scmp.ne.s32.totalorder %s546_s17, 0 }
 0x1f7   :  { %550 = shalt.err (%p678_p0)  }
 0x1f8   :  { %552 = vsyncmov [#allocation3 + $0x4] }
 0x1fb   :  { %s553_s11 = vpop.sfrf %552 }
 0x1fc   :  { %p679_p1 = scmp.ne.s32.totalorder %s553_s11, 0 }
 0x1fe   :  { %557 = shalt.err (%p679_p1)  }
 0x1ff   :  { %559 = vsyncmov [#allocation3 + $0x5] }
 0x202   :  { %s560_s1 = vpop.sfrf %559 }
 0x203   :  { %p680_p2 = scmp.ne.s32.totalorder %s560_s1, 0 }
 0x205   :  { %564 = shalt.err (%p680_p2)  }
 0x206   :  { %566 = vsyncmov [#allocation3 + $0x6] }
 0x209   :  { %s567_s2 = vpop.sfrf %566 }
 0x20a   :  { %p681_p3 = scmp.ne.s32.totalorder %s567_s2, 0 }
 0x20c   :  { %571 = shalt.err (%p681_p3)  }
 0x20d   :  { %573 = vsyncmov [#allocation3 + $0x7] }
 0x210   :  { %s574_s3 = vpop.sfrf %573 }
 0x211   :  { %p682_p4 = scmp.ne.s32.totalorder %s574_s3, 0 }
 0x213   :  { %578 = shalt.err (%p682_p4)  }

</bundles_post_ra>
